<compile_context>
chip_gen: v5e
topology: v5e:2x2
jax: 0.10.0
libtpu: 0.0.40
codegen_flags: <defaults>
</compile_context>

<pallas_src>
import math
import jax
import jax.numpy as jnp
from jax.experimental import pallas as pl
from jax.experimental.pallas import tpu as pltpu


LAYERS = ("fc1", "fc2", "fc3", "fc4", "out")
LAYER_DIMS = {"fc1": (15, 64), "fc2": (64, 64), "fc3": (64, 64),
              "fc4": (64, 64), "out": (64, 6)}


def mancala_mlp_kernel(x_ref,
                       w1_ref, b1_ref, w2_ref, b2_ref, w3_ref, b3_ref,
                       w4_ref, b4_ref, wo_ref, bo_ref,
                       o_ref):
    # Feature-major: x_ref (16, TB) bf16; weights (out, in) bf16; biases (out, 1) f32.
    h = x_ref[...]                                             # already bf16, batch on lanes
    for w_ref, b_ref in ((w1_ref, b1_ref), (w2_ref, b2_ref),
                         (w3_ref, b3_ref), (w4_ref, b4_ref)):
        acc = jnp.dot(w_ref[...], h, preferred_element_type=jnp.float32)
        h = jnp.maximum(acc + b_ref[...], 0.0).astype(jnp.bfloat16)
    out = jnp.dot(wo_ref[...], h, preferred_element_type=jnp.float32) + bo_ref[...]
    o_ref[...] = out.astype(o_ref.dtype)                       # (6, TB) lane-dense store


def _choose_batch_tiling(B, block_b):
    """Pick (tb, num_blocks, b_pad): 128-aligned tile, minimal tail padding,
    and >=2 blocks whenever B > 128 so v7x's second TensorCore gets work."""
    max_chunks = block_b // 128
    rows = pl.cdiv(B, 128)                 # number of 128-lane batch chunks
    k = pl.cdiv(rows, max_chunks)          # minimal block count respecting block_b
    if rows >= 2:
        k = max(k, 2)                      # feed both TCs on v7x for B > 128
    tb = 128 * pl.cdiv(rows, k)            # balanced tiles -> minimal tail-pad waste
    b_pad = tb * k
    return tb, k, b_pad


def mancala_net_forward(x, params, *, block_b=2048, feature_major_out=False):
    """x: (B, 15) f32. params[name] = (w (out,in) f32, b (out,1) f32).
    Returns (B, 6) f32, or (6, B_pad) f32 when feature_major_out=True."""
    assert block_b % 128 == 0
    B = x.shape[0]
    tb, num_blocks, b_pad = _choose_batch_tiling(B, block_b)

    # Feature-major bf16 input, K padded 15 -> 16, batch padded to tile boundary
    # in one fused pad (no full padded f32 copy of the rollout batch in HBM).
    xt = jnp.pad(x.astype(jnp.bfloat16).T, ((0, 1), (0, b_pad - B)))   # (16, b_pad)

    args = [xt]
    in_specs = [pl.BlockSpec((16, tb), lambda i: (0, i))]
    for name in LAYERS:
        w, b = params[name]
        if name == "fc1":
            w = jnp.pad(w, ((0, 0), (0, 1)))            # (64, 16): zero K column
        args.append(w.astype(jnp.bfloat16))              # bf16 MXU operands (cast once)
        args.append(b.astype(jnp.float32))               # f32 bias added after f32 acc
        in_specs.append(pl.BlockSpec(args[-2].shape, lambda i: (0, 0)))  # VMEM-resident
        in_specs.append(pl.BlockSpec(args[-1].shape, lambda i: (0, 0)))

    grid_spec = pltpu.PrefetchScalarGridSpec(
        num_scalar_prefetch=0,
        grid=(num_blocks,),
        in_specs=in_specs,
        out_specs=pl.BlockSpec((6, tb), lambda i: (0, i)),
    )

    out_t = pl.pallas_call(
        mancala_mlp_kernel,
        out_shape=jax.ShapeDtypeStruct((6, b_pad), jnp.float32),
        grid_spec=grid_spec,
        compiler_params=pltpu.CompilerParams(
            dimension_semantics=("parallel",),       # megacore split of the batch axis
            vmem_limit_bytes=32 * 1024 * 1024,       # footprint is only a few MiB even at tb=4096
        ),
    )(*args)

    if feature_major_out:
        return out_t                                  # (6, b_pad): skip the HBM transpose pass
    return out_t[:, :B].T                             # (B, 6), torch layout


def init_params(key):
    """Deterministic init matching torch nn.Linear: w (out, in), b (out, 1)."""
    params = {}
    for name in LAYERS:
        fan_in, fan_out = LAYER_DIMS[name]
        key, kw, kb = jax.random.split(key, 3)
        bound = 1.0 / math.sqrt(fan_in)               # PyTorch default Linear init range
        w = jax.random.uniform(kw, (fan_out, fan_in), jnp.float32, -bound, bound)
        b = jax.random.uniform(kb, (fan_out, 1), jnp.float32, -bound, bound)
        params[name] = (w, b)
    return params


def reference_forward(x, params):
    """Pure-JAX f32 reference with torch semantics: relu(x @ W.T + b) chain."""
    h = x.astype(jnp.float32)
    for name in LAYERS[:-1]:
        w, b = params[name]
        h = jnp.maximum(h @ w.T + b[:, 0], 0.0)
    w, b = params["out"]
    return h @ w.T + b[:, 0]


# TODO(synk): choose_move()/save() are host-side game logic (legal-move masking,
# argmax over 6 logits, file I/O) and are intentionally not part of the TPU kernel.


if __name__ == "__main__":
    key = jax.random.PRNGKey(0)
    key, kx = jax.random.split(key)
    B = 2
    x = jax.random.uniform(kx, (B, 15), jnp.float32, 0.0, 4.0)   # board-count-like inputs

    params = init_params(key)

    y = mancala_net_forward(x, params)
    y = jax.block_until_ready(y)

    y_ref = reference_forward(x, params)
    assert y.shape == (B, 6)
    # bf16 MXU operands with f32 accumulation vs. the full-f32 reference.
    assert jnp.allclose(y, y_ref, atol=5e-2, rtol=5e-2)

    # Multi-tile batch grid (>=2 blocks) + tail padding + balanced tiles.
    B2 = 300
    key, kx2 = jax.random.split(key)
    x2 = jax.random.uniform(kx2, (B2, 15), jnp.float32, 0.0, 4.0)
    y2 = jax.block_until_ready(mancala_net_forward(x2, params, block_b=256))
    assert y2.shape == (B2, 6)
    assert jnp.allclose(y2, reference_forward(x2, params), atol=5e-2, rtol=5e-2)

    # Default (large) tile path + feature-major output option.
    y3 = jax.block_until_ready(mancala_net_forward(x2, params, feature_major_out=True))
    assert y3.shape[0] == 6
    assert jnp.allclose(y3[:, :B2].T, reference_forward(x2, params), atol=5e-2, rtol=5e-2)

    print("KERNEL_OK")
</pallas_src>

<mosaic_0001>
module attributes {stable_mosaic.version = 11 : i64} {
  func.func @mancala_mlp_kernel(%arg0: i32, %arg1: memref<16x128xbf16, #tpu.memory_space<vmem>>, %arg2: memref<64x16xbf16, #tpu.memory_space<vmem>>, %arg3: memref<64x1xf32, #tpu.memory_space<vmem>>, %arg4: memref<64x64xbf16, #tpu.memory_space<vmem>>, %arg5: memref<64x1xf32, #tpu.memory_space<vmem>>, %arg6: memref<64x64xbf16, #tpu.memory_space<vmem>>, %arg7: memref<64x1xf32, #tpu.memory_space<vmem>>, %arg8: memref<64x64xbf16, #tpu.memory_space<vmem>>, %arg9: memref<64x1xf32, #tpu.memory_space<vmem>>, %arg10: memref<6x64xbf16, #tpu.memory_space<vmem>>, %arg11: memref<6x1xf32, #tpu.memory_space<vmem>>, %arg12: memref<6x128xf32, #tpu.memory_space<vmem>>) attributes {dimension_semantics = [#tpu.dimension_semantics<parallel>], iteration_bounds = array<i64: 1>, scalar_prefetch = 0 : i64, scratch_operands = 0 : i64, tpu.core_type = #tpu.core_type<tc>, window_params = [{transform_indices = @transform_0, window_bounds = array<i64: 16, 128>}, {pipeline_mode = #tpu.pipeline_mode<synchronous>, transform_indices = @transform_1, window_bounds = array<i64: 64, 16>}, {pipeline_mode = #tpu.pipeline_mode<synchronous>, transform_indices = @transform_2, window_bounds = array<i64: 64, 1>}, {pipeline_mode = #tpu.pipeline_mode<synchronous>, transform_indices = @transform_3, window_bounds = array<i64: 64, 64>}, {pipeline_mode = #tpu.pipeline_mode<synchronous>, transform_indices = @transform_4, window_bounds = array<i64: 64, 1>}, {pipeline_mode = #tpu.pipeline_mode<synchronous>, transform_indices = @transform_5, window_bounds = array<i64: 64, 64>}, {pipeline_mode = #tpu.pipeline_mode<synchronous>, transform_indices = @transform_6, window_bounds = array<i64: 64, 1>}, {pipeline_mode = #tpu.pipeline_mode<synchronous>, transform_indices = @transform_7, window_bounds = array<i64: 64, 64>}, {pipeline_mode = #tpu.pipeline_mode<synchronous>, transform_indices = @transform_8, window_bounds = array<i64: 64, 1>}, {pipeline_mode = #tpu.pipeline_mode<synchronous>, transform_indices = @transform_9, window_bounds = array<i64: 6, 64>}, {pipeline_mode = #tpu.pipeline_mode<synchronous>, transform_indices = @transform_10, window_bounds = array<i64: 6, 1>}, {transform_indices = @transform_11, window_bounds = array<i64: 6, 128>}]} {
    %c0 = arith.constant 0 : index
    %c0_0 = arith.constant 0 : index
    %0 = vector.load %arg1[%c0, %c0_0] : memref<16x128xbf16, #tpu.memory_space<vmem>>, vector<16x128xbf16>
    %c0_1 = arith.constant 0 : index
    %c0_2 = arith.constant 0 : index
    %1 = vector.load %arg2[%c0_1, %c0_2] : memref<64x16xbf16, #tpu.memory_space<vmem>>, vector<64x16xbf16>
    %cst = arith.constant dense<0.000000e+00> : vector<64x128xf32>
    %2 = tpu.matmul %1, %0, %cst {dimension_numbers = #tpu.dot_dimension_numbers<[1], [0], [0], [1], [0, 0, 1, 1], [], []>} : vector<64x16xbf16>, vector<16x128xbf16>, vector<64x128xf32> -> vector<64x128xf32>
    %c0_3 = arith.constant 0 : index
    %c0_4 = arith.constant 0 : index
    %3 = vector.load %arg3[%c0_3, %c0_4] : memref<64x1xf32, #tpu.memory_space<vmem>>, vector<64x1xf32>
    %4 = vector.broadcast %3 : vector<64x1xf32> to vector<64x128xf32>
    %5 = arith.addf %2, %4 : vector<64x128xf32>
    %cst_5 = arith.constant 0.000000e+00 : f32
    %6 = vector.broadcast %cst_5 : f32 to vector<64x128xf32>
    %7 = arith.maximumf %5, %6 : vector<64x128xf32>
    %8 = arith.truncf %7 : vector<64x128xf32> to vector<64x128xbf16>
    %c0_6 = arith.constant 0 : index
    %c0_7 = arith.constant 0 : index
    %9 = vector.load %arg4[%c0_6, %c0_7] : memref<64x64xbf16, #tpu.memory_space<vmem>>, vector<64x64xbf16>
    %cst_8 = arith.constant dense<0.000000e+00> : vector<64x128xf32>
    %10 = tpu.matmul %9, %8, %cst_8 {dimension_numbers = #tpu.dot_dimension_numbers<[1], [0], [0], [1], [0, 0, 1, 1], [], []>} : vector<64x64xbf16>, vector<64x128xbf16>, vector<64x128xf32> -> vector<64x128xf32>
    %c0_9 = arith.constant 0 : index
    %c0_10 = arith.constant 0 : index
    %11 = vector.load %arg5[%c0_9, %c0_10] : memref<64x1xf32, #tpu.memory_space<vmem>>, vector<64x1xf32>
    %12 = vector.broadcast %11 : vector<64x1xf32> to vector<64x128xf32>
    %13 = arith.addf %10, %12 : vector<64x128xf32>
    %cst_11 = arith.constant 0.000000e+00 : f32
    %14 = vector.broadcast %cst_11 : f32 to vector<64x128xf32>
    %15 = arith.maximumf %13, %14 : vector<64x128xf32>
    %16 = arith.truncf %15 : vector<64x128xf32> to vector<64x128xbf16>
    %c0_12 = arith.constant 0 : index
    %c0_13 = arith.constant 0 : index
    %17 = vector.load %arg6[%c0_12, %c0_13] : memref<64x64xbf16, #tpu.memory_space<vmem>>, vector<64x64xbf16>
    %cst_14 = arith.constant dense<0.000000e+00> : vector<64x128xf32>
    %18 = tpu.matmul %17, %16, %cst_14 {dimension_numbers = #tpu.dot_dimension_numbers<[1], [0], [0], [1], [0, 0, 1, 1], [], []>} : vector<64x64xbf16>, vector<64x128xbf16>, vector<64x128xf32> -> vector<64x128xf32>
    %c0_15 = arith.constant 0 : index
    %c0_16 = arith.constant 0 : index
    %19 = vector.load %arg7[%c0_15, %c0_16] : memref<64x1xf32, #tpu.memory_space<vmem>>, vector<64x1xf32>
    %20 = vector.broadcast %19 : vector<64x1xf32> to vector<64x128xf32>
    %21 = arith.addf %18, %20 : vector<64x128xf32>
    %cst_17 = arith.constant 0.000000e+00 : f32
    %22 = vector.broadcast %cst_17 : f32 to vector<64x128xf32>
    %23 = arith.maximumf %21, %22 : vector<64x128xf32>
    %24 = arith.truncf %23 : vector<64x128xf32> to vector<64x128xbf16>
    %c0_18 = arith.constant 0 : index
    %c0_19 = arith.constant 0 : index
    %25 = vector.load %arg8[%c0_18, %c0_19] : memref<64x64xbf16, #tpu.memory_space<vmem>>, vector<64x64xbf16>
    %cst_20 = arith.constant dense<0.000000e+00> : vector<64x128xf32>
    %26 = tpu.matmul %25, %24, %cst_20 {dimension_numbers = #tpu.dot_dimension_numbers<[1], [0], [0], [1], [0, 0, 1, 1], [], []>} : vector<64x64xbf16>, vector<64x128xbf16>, vector<64x128xf32> -> vector<64x128xf32>
    %c0_21 = arith.constant 0 : index
    %c0_22 = arith.constant 0 : index
    %27 = vector.load %arg9[%c0_21, %c0_22] : memref<64x1xf32, #tpu.memory_space<vmem>>, vector<64x1xf32>
    %28 = vector.broadcast %27 : vector<64x1xf32> to vector<64x128xf32>
    %29 = arith.addf %26, %28 : vector<64x128xf32>
    %cst_23 = arith.constant 0.000000e+00 : f32
    %30 = vector.broadcast %cst_23 : f32 to vector<64x128xf32>
    %31 = arith.maximumf %29, %30 : vector<64x128xf32>
    %32 = arith.truncf %31 : vector<64x128xf32> to vector<64x128xbf16>
    %c0_24 = arith.constant 0 : index
    %c0_25 = arith.constant 0 : index
    %33 = vector.load %arg10[%c0_24, %c0_25] : memref<6x64xbf16, #tpu.memory_space<vmem>>, vector<6x64xbf16>
    %cst_26 = arith.constant dense<0.000000e+00> : vector<6x128xf32>
    %34 = tpu.matmul %33, %32, %cst_26 {dimension_numbers = #tpu.dot_dimension_numbers<[1], [0], [0], [1], [0, 0, 1, 1], [], []>} : vector<6x64xbf16>, vector<64x128xbf16>, vector<6x128xf32> -> vector<6x128xf32>
    %c0_27 = arith.constant 0 : index
    %c0_28 = arith.constant 0 : index
    %35 = vector.load %arg11[%c0_27, %c0_28] : memref<6x1xf32, #tpu.memory_space<vmem>>, vector<6x1xf32>
    %36 = vector.broadcast %35 : vector<6x1xf32> to vector<6x128xf32>
    %37 = arith.addf %34, %36 : vector<6x128xf32>
    %c0_29 = arith.constant 0 : index
    %c0_30 = arith.constant 0 : index
    %38 = vector.load %arg12[%c0_29, %c0_30] : memref<6x128xf32, #tpu.memory_space<vmem>>, vector<6x128xf32>
    tpu.vector_store %arg12[%c0_29, %c0_30], %37 {strides = array<i32>} : memref<6x128xf32, #tpu.memory_space<vmem>>, vector<6x128xf32>,
    return
  }
  func.func @transform_0(%arg0: i32) -> (i32, i32) {
    %c0_i32 = arith.constant 0 : i32
    %c0_i32_0 = arith.constant 0 : i32
    return %c0_i32, %arg0 : i32, i32
  }
  func.func @transform_1(%arg0: i32) -> (i32, i32) {
    %c0_i32 = arith.constant 0 : i32
    %c0_i32_0 = arith.constant 0 : i32
    %c0_i32_1 = arith.constant 0 : i32
    return %c0_i32, %c0_i32_0 : i32, i32
  }
  func.func @transform_2(%arg0: i32) -> (i32, i32) {
    %c0_i32 = arith.constant 0 : i32
    %c0_i32_0 = arith.constant 0 : i32
    %c0_i32_1 = arith.constant 0 : i32
    return %c0_i32, %c0_i32_0 : i32, i32
  }
  func.func @transform_3(%arg0: i32) -> (i32, i32) {
    %c0_i32 = arith.constant 0 : i32
    %c0_i32_0 = arith.constant 0 : i32
    %c0_i32_1 = arith.constant 0 : i32
    return %c0_i32, %c0_i32_0 : i32, i32
  }
  func.func @transform_4(%arg0: i32) -> (i32, i32) {
    %c0_i32 = arith.constant 0 : i32
    %c0_i32_0 = arith.constant 0 : i32
    %c0_i32_1 = arith.constant 0 : i32
    return %c0_i32, %c0_i32_0 : i32, i32
  }
  func.func @transform_5(%arg0: i32) -> (i32, i32) {
    %c0_i32 = arith.constant 0 : i32
    %c0_i32_0 = arith.constant 0 : i32
    %c0_i32_1 = arith.constant 0 : i32
    return %c0_i32, %c0_i32_0 : i32, i32
  }
  func.func @transform_6(%arg0: i32) -> (i32, i32) {
    %c0_i32 = arith.constant 0 : i32
    %c0_i32_0 = arith.constant 0 : i32
    %c0_i32_1 = arith.constant 0 : i32
    return %c0_i32, %c0_i32_0 : i32, i32
  }
  func.func @transform_7(%arg0: i32) -> (i32, i32) {
    %c0_i32 = arith.constant 0 : i32
    %c0_i32_0 = arith.constant 0 : i32
    %c0_i32_1 = arith.constant 0 : i32
    return %c0_i32, %c0_i32_0 : i32, i32
  }
  func.func @transform_8(%arg0: i32) -> (i32, i32) {
    %c0_i32 = arith.constant 0 : i32
    %c0_i32_0 = arith.constant 0 : i32
    %c0_i32_1 = arith.constant 0 : i32
    return %c0_i32, %c0_i32_0 : i32, i32
  }
  func.func @transform_9(%arg0: i32) -> (i32, i32) {
    %c0_i32 = arith.constant 0 : i32
    %c0_i32_0 = arith.constant 0 : i32
    %c0_i32_1 = arith.constant 0 : i32
    return %c0_i32, %c0_i32_0 : i32, i32
  }
  func.func @transform_10(%arg0: i32) -> (i32, i32) {
    %c0_i32 = arith.constant 0 : i32
    %c0_i32_0 = arith.constant 0 : i32
    %c0_i32_1 = arith.constant 0 : i32
    return %c0_i32, %c0_i32_0 : i32, i32
  }
  func.func @transform_11(%arg0: i32) -> (i32, i32) {
    %c0_i32 = arith.constant 0 : i32
    %c0_i32_0 = arith.constant 0 : i32
    return %c0_i32, %arg0 : i32, i32
  }
}

</mosaic_0001>

<bundles_post_ra>
// kernel: tpu_custom_call.1
= control target key start
LH: loop header
LB: loop body
LE: loop exit
PB: predicated region body
PF: predicated region fallthrough
CT: control target
= control target key end

     0   :  { %v739_v3 = vmov 0   ;;  %vm124_vm0 = vcmask 130048   ;;  %s974_s0 = inlined_call_operand.vmem [shape: bf16[16,128], index: 0, kind: input, shape index: {}]   ;;  %s975_s1 = inlined_call_operand.vmem [shape: bf16[64,16], index: 1, kind: input, shape index: {}]   ;;  %s976_s2 = inlined_call_operand.vmem [shape: f32[64,1], index: 2, kind: input, shape index: {}]   ;;  %s977_s3 = inlined_call_operand.vmem [shape: bf16[64,64], index: 3, kind: input, shape index: {}]   ;;  %s978_s4 = inlined_call_operand.vmem [shape: f32[64,1], index: 4, kind: input, shape index: {}]   ;;  %s979_s5 = inlined_call_operand.vmem [shape: bf16[64,64], index: 5, kind: input, shape index: {}]   ;;  %s980_s6 = inlined_call_operand.vmem [shape: f32[64,1], index: 6, kind: input, shape index: {}]   ;;  %s981_s7 = inlined_call_operand.vmem [shape: bf16[64,64], index: 7, kind: input, shape index: {}]   ;;  %s982_s8 = inlined_call_operand.vmem [shape: f32[64,1], index: 8, kind: input, shape index: {}]   ;;  %s983_s9 = inlined_call_operand.vmem [shape: bf16[6,64], index: 9, kind: input, shape index: {}]   ;;  %s984_s10 = inlined_call_operand.vmem [shape: f32[6,1], index: 10, kind: input, shape index: {}]   ;;  %s985_s11 = inlined_call_operand.hbm [shape: f32[6,128], index: 11, kind: output, shape index: {}]  }
   0x1   :  { %v56_v0 = vld [vmem:[%s976_s2 + $0x30] sm:$0xff]  ;;  %v54_v1 = vld [vmem:[%s976_s2 + $0x20] sm:$0xff]  ;;  %711 = vset.pattern.permute.xlu1 %v739_v3  ;;  %710 = vset.pattern.permute.xlu0 %v739_v3 }
   0x2   :  { %v691_v2 = vld [vmem:[%s974_s0] sm:$0xff]  ;;  %90 = vperm.xlu0 %710, %v56_v0   ;;  %80 = vperm.xlu1 %711, %v54_v1   ;;  %v52_v5 = vld [vmem:[%s976_s2 + $0x10] sm:$0xff] }
   0x3   :  { %v692_v4 = vld [vmem:[%s975_s1] sm:$0xff]  ;;  %144 = vmatpush.bf16.msra.mxu0 %v691_v2  ;;  %712 = vset.pattern.permute.xlu2 %v739_v3 }
   0x4   :  { %70 = vperm.xlu2 %712, %v52_v5  }
   0x5   :  { %16 = vsyncpa [#allocation3], 0  ;;  %v57_v6 = vld [vmem:[%s976_s2 + $0x38] sm:$0xff]  ;;  %v55_v7 = vld [vmem:[%s976_s2 + $0x28] sm:$0xff]  ;;  %vm254_vm1 = vcmask 523264  }
   0x6   :  { %626 = vmatmul.msk.bf16.vlgmr.msra.gmra.mxu0 %vm124_vm0, %v692_v4  ;;  %v53_v8 = vld [vmem:[%s976_s2 + $0x18] sm:$0xff]  ;;  %v51_v9 = vld [vmem:[%s976_s2 + $0x8] sm:$0xff]  ;;  %v50_v10 = vld [vmem:[%s976_s2] sm:$0xff]  ;;  %s740_s2 = smov [#allocation2]  }
   0x7   :  { %v192_v11 = vld [vmem:[%s978_s4 + $0x30] sm:$0xff]  ;;  %v693_v12 = vld [vmem:[%s975_s1 + $0x8] sm:$0xff]  ;;  %v190_v13 = vld [vmem:[%s978_s4 + $0x20] sm:$0xff] }
   0x8   :  { %v193_v14 = vld [vmem:[%s978_s4 + $0x38] sm:$0xff]  ;;  %v191_v15 = vld [vmem:[%s978_s4 + $0x28] sm:$0xff]  ;;  %v188_v17 = vld [vmem:[%s978_s4 + $0x10] sm:$0xff] }
   0x9   :  { %v189_v16 = vld [vmem:[%s978_s4 + $0x18] sm:$0xff]  ;;  %v186_v18 = vld [vmem:[%s978_s4] sm:$0xff]  ;;  %v694_v19 = vld [vmem:[%s975_s1 + $0x10] sm:$0xff] }
   0xa   :  { %95 = vperm.xlu0 %710, %v57_v6   ;;  %85 = vperm.xlu1 %711, %v55_v7   ;;  %v322_v20 = vld [vmem:[%s980_s6 + $0x30] sm:$0xff]  ;;  %v187_v21 = vld [vmem:[%s978_s4 + $0x8] sm:$0xff]  ;;  %v323_v22 = vld [vmem:[%s980_s6 + $0x38] sm:$0xff]  ;;  %s595_s4 = sshll.u32 %s740_s2, 4  ;;  %s596_s4 = int_to_ptr.vmem [resolvable:$true] %s595_s4 }
   0xb   :  { %v321_v23 = vld [vmem:[%s980_s6 + $0x28] sm:$0xff]  ;;  %v320_v24 = vld [vmem:[%s980_s6 + $0x20] sm:$0xff]  ;;  %v318_v25 = vld [vmem:[%s980_s6 + $0x10] sm:$0xff] }
   0xc   :  { %75 = vperm.xlu2 %712, %v53_v8   ;;  %v695_v26 = vld [vmem:[%s975_s1 + $0x18] sm:$0xff]  ;;  %v316_v27 = vld [vmem:[%s980_s6] sm:$0xff]  ;;  %v317_v29 = vld [vmem:[%s980_s6 + $0x8] sm:$0xff] }
   0xd   :  { %v319_v28 = vld [vmem:[%s980_s6 + $0x18] sm:$0xff]  ;;  %v451_v31 = vld [vmem:[%s982_s8 + $0x30] sm:$0xff]  ;;  %v449_v32 = vld [vmem:[%s982_s8 + $0x20] sm:$0xff] }
   0xe   :  { %v452_v30 = vld [vmem:[%s982_s8 + $0x38] sm:$0xff]  ;;  %v447_v33 = vld [vmem:[%s982_s8 + $0x10] sm:$0xff]  ;;  %v450_v34 = vld [vmem:[%s982_s8 + $0x28] sm:$0xff] }
   0xf   :  { %v448_v35 = vld [vmem:[%s982_s8 + $0x18] sm:$0xff]  ;;  %v446_v36 = vld [vmem:[%s982_s8 + $0x8] sm:$0xff]  ;;  %v445_v37 = vld [vmem:[%s982_s8] sm:$0xff] }
  0x10   :  { %v567_v38 = vld [vmem:[%s984_s10] sm:$0x3f]  ;;  %s597_s10 = sshll.u32 %s985_s11, 4  ;;  %s598_s10 = int_to_ptr.hbm [resolvable:$true] %s597_s10 }
  0x12   :  { %65 = vperm.xlu1 %711, %v51_v9   ;;  %60 = vperm.xlu0 %710, %v50_v10  }
  0x14   :  { %226 = vperm.xlu2 %712, %v192_v11   ;;  %v696_v11 = vld [vmem:[%s977_s3] sm:$0xff] }
  0x16   :  { %627 = vmatmul.msk.bf16.gmra.mxu0 %vm124_vm0, %v693_v12  ;;  %v697_v12 = vld [vmem:[%s977_s3 + $0x8] sm:$0xff] }
  0x1a   :  { %216 = vperm.xlu1 %711, %v190_v13   ;;  %231 = vperm.xlu0 %710, %v193_v14   ;;  %v698_v13 = vld [vmem:[%s977_s3 + $0x10] sm:$0xff]  ;;  %v699_v14 = vld [vmem:[%s977_s3 + $0x18] sm:$0xff] }
  0x1c   :  { %221 = vperm.xlu2 %712, %v191_v15  }
  0x22   :  { %211 = vperm.xlu1 %711, %v189_v16   ;;  %206 = vperm.xlu0 %710, %v188_v17  }
  0x24   :  { %196 = vperm.xlu2 %712, %v186_v18  }
  0x26   :  { %628 = vmatmul.msk.bf16.gmra.mxu0 %vm124_vm0, %v694_v19 }
  0x2a   :  { %356 = vperm.xlu1 %711, %v322_v20   ;;  %201 = vperm.xlu0 %710, %v187_v21  }
  0x2c   :  { %361 = vperm.xlu2 %712, %v323_v22  }
  0x32   :  { %351 = vperm.xlu1 %711, %v321_v23   ;;  %346 = vperm.xlu0 %710, %v320_v24  }
  0x34   :  { %336 = vperm.xlu2 %712, %v318_v25  }
  0x36   :  { %629 = vmatmul.msk.bf16.gmra.mxu0 %vm124_vm0, %v695_v26 }
  0x3a   :  { %326 = vperm.xlu1 %711, %v316_v27   ;;  %341 = vperm.xlu0 %710, %v319_v28  }
  0x3c   :  { %331 = vperm.xlu2 %712, %v317_v29  }
  0x42   :  { %490 = vperm.xlu1 %711, %v452_v30   ;;  %485 = vperm.xlu0 %710, %v451_v31  }
  0x44   :  { %475 = vperm.xlu2 %712, %v449_v32  }
  0x4a   :  { %465 = vperm.xlu1 %711, %v447_v33   ;;  %480 = vperm.xlu0 %710, %v450_v34  }
  0x4c   :  { %470 = vperm.xlu2 %712, %v448_v35  }
  0x52   :  { %460 = vperm.xlu1 %711, %v446_v36   ;;  %455 = vperm.xlu0 %710, %v445_v37  }
  0x54   :  { %570 = vperm.xlu2 %712, %v567_v38  }
  0x5e   :  { %v71_v48 = vpop.permute.xlu2 %70 }
  0x66   :  { %v76_v58 = vpop.permute.xlu2 %75 }
  0x6e   :  { %v227_v22 = vpop.permute.xlu2 %226 }
  0x74   :  { %v91_v45 = vpop.permute.xlu0 %90  ;;  %v81_v46 = vpop.permute.xlu1 %80 }
  0x76   :  { %v222_v27 = vpop.permute.xlu2 %221 }
  0x7c   :  { %v96_v49 = vpop.permute.xlu0 %95  ;;  %v86_v50 = vpop.permute.xlu1 %85 }
  0x83   :  { %v146_v39 = vpop.f32.mrf.mxu0 }
  0x84   :  { %v66_v0 = vpop.permute.xlu1 %65  ;;  %v61_v1 = vpop.permute.xlu0 %60 }
  0x85   :  { %v147_v5 = vadd.f32 %v146_v39, %v61_v1 }
  0x87   :  { %v166_v9 = vmax.f32 %v147_v5, 0.0 }
  0x8b   :  { %v148_v40 = vpop.f32.mrf.mxu0 }
  0x8c   :  { %v149_v2 = vadd.f32 %v148_v40, %v66_v0  ;;  %v232_v21 = vpop.permute.xlu0 %231  ;;  %v217_v24 = vpop.permute.xlu1 %216 }
  0x8e   :  { %v167_v7 = vmax.f32 %v149_v2, 0.0 }
  0x90   :  { %v174_v10 = vpack.c.bf16 %v167_v7, %v166_v9 }
  0x93   :  { %v151_v41 = vpop.f32.mrf.mxu0 }
  0x94   :  { %v152_v62 = vadd.f32 %v151_v41, %v71_v48  ;;  %v207_v25 = vpop.permute.xlu0 %206  ;;  %v212_v34 = vpop.permute.xlu1 %211 }
  0x96   :  { %v168_v6 = vmax.f32 %v152_v62, 0.0 }
  0x9b   :  { %v153_v42 = vpop.f32.mrf.mxu0 }
  0x9c   :  { %v154_v59 = vadd.f32 %v153_v42, %v76_v58  ;;  %v202_v40 = vpop.permute.xlu0 %201  ;;  %v357_v62 = vpop.permute.xlu1 %356 }
  0x9e   :  { %v169_v3 = vmax.f32 %v154_v59, 0.0 }
  0xa0   :  { %v175_v8 = vpack.c.bf16 %v169_v3, %v168_v6 }
  0xa3   :  { %v156_v43 = vpop.f32.mrf.mxu0 }
  0xa4   :  { %v157_v55 = vadd.f32 %v156_v43, %v81_v46  ;;  %v347_v0 = vpop.permute.xlu0 %346  ;;  %v352_v3 = vpop.permute.xlu1 %351 }
  0xa6   :  { %v170_v63 = vmax.f32 %v157_v55, 0.0 }
  0xab   :  { %v158_v44 = vpop.f32.mrf.mxu0 }
  0xac   :  { %v159_v53 = vadd.f32 %v158_v44, %v86_v50  ;;  %v197_v44 = vpop.permute.xlu2 %196 }
  0xae   :  { %v171_v60 = vmax.f32 %v159_v53, 0.0  ;;  %v702_v53 = vld [vmem:[%s979_s5 + $0x10] sm:$0xff] }
  0xb0   :  { %v176_v4 = vpack.c.bf16 %v171_v60, %v170_v63 }
  0xb3   :  { %v161_v47 = vpop.f32.mrf.mxu0 }
  0xb4   :  { %v162_v51 = vadd.f32 %v161_v47, %v91_v45 }
  0xb6   :  { %v172_v56 = vmax.f32 %v162_v51, 0.0  ;;  %v700_v51 = vld [vmem:[%s979_s5] sm:$0xff] }
  0xbb   :  { %v163_v52 = vpop.f32.mrf.mxu0 }
  0xbc   :  { %v164_v54 = vadd.f32 %v163_v52, %v96_v49  ;;  %v701_v52 = vld [vmem:[%s979_s5 + $0x8] sm:$0xff] }
  0xbe   :  { %v173_v57 = vmax.f32 %v164_v54, 0.0  ;;  %v703_v54 = vld [vmem:[%s979_s5 + $0x18] sm:$0xff] }
  0xc0   :  { %v177_v61 = vpack.c.bf16 %v173_v57, %v172_v56 }
  0xc2   :  { %271 = vmatpush.bf16.msra.mxu1 %v177_v61  ;;  %v362_v61 = vpop.permute.xlu2 %361 }
  0xc6   :  { %272 = vmatpush.bf16.msra.mxu1 %v176_v4 }
  0xca   :  { %273 = vmatpush.bf16.msra.mxu1 %v175_v8  ;;  %v337_v1 = vpop.permute.xlu2 %336 }
  0xce   :  { %274 = vmatpush.bf16.msra.mxu1 %v174_v10  ;;  %v342_v10 = vpop.permute.xlu0 %341 }
  0xd1   :  { %646 = vmatmul.msk.bf16.vlgmr.msra.gmra.mxu1 %vm254_vm1, %v696_v11 }
  0xe1   :  { %647 = vmatmul.msk.bf16.gmra.mxu1 %vm254_vm1, %v697_v12 }
  0xf1   :  { %648 = vmatmul.msk.bf16.gmra.mxu1 %vm254_vm1, %v698_v13 }
 0x101   :  { %649 = vmatmul.msk.bf16.gmra.mxu1 %vm254_vm1, %v699_v14 }
 0x14e   :  { %v276_v15 = vpop.f32.mrf.mxu1 }
 0x14f   :  { %v277_v45 = vadd.f32 %v276_v15, %v197_v44 }
 0x151   :  { %v296_v49 = vmax.f32 %v277_v45, 0.0 }
 0x156   :  { %v278_v16 = vpop.f32.mrf.mxu1 }
 0x157   :  { %v279_v41 = vadd.f32 %v278_v16, %v202_v40  ;;  %v332_v16 = vpop.permute.xlu2 %331 }
 0x159   :  { %v297_v47 = vmax.f32 %v279_v41, 0.0 }
 0x15b   :  { %v304_v50 = vpack.c.bf16 %v297_v47, %v296_v49 }
 0x15e   :  { %v281_v17 = vpop.f32.mrf.mxu1 }
 0x15f   :  { %v282_v38 = vadd.f32 %v281_v17, %v207_v25  ;;  %v476_v40 = vpop.permute.xlu2 %475 }
 0x161   :  { %v298_v46 = vmax.f32 %v282_v38, 0.0  ;;  %v486_v38 = vpop.permute.xlu0 %485 }
 0x166   :  { %v283_v18 = vpop.f32.mrf.mxu1 }
 0x167   :  { %v284_v35 = vadd.f32 %v283_v18, %v212_v34 }
 0x169   :  { %v299_v42 = vmax.f32 %v284_v35, 0.0 }
 0x16b   :  { %v305_v48 = vpack.c.bf16 %v299_v42, %v298_v46 }
 0x16e   :  { %v286_v19 = vpop.f32.mrf.mxu1 }
 0x16f   :  { %v287_v31 = vadd.f32 %v286_v19, %v217_v24 }
 0x171   :  { %v300_v39 = vmax.f32 %v287_v31, 0.0 }
 0x176   :  { %v288_v20 = vpop.f32.mrf.mxu1 }
 0x177   :  { %v289_v29 = vadd.f32 %v288_v20, %v222_v27  ;;  %v327_v20 = vpop.permute.xlu1 %326  ;;  %v704_v27 = vld [vmem:[%s981_s7] sm:$0xff] }
 0x179   :  { %v301_v36 = vmax.f32 %v289_v29, 0.0  ;;  %v706_v29 = vld [vmem:[%s981_s7 + $0x10] sm:$0xff] }
 0x17b   :  { %v306_v43 = vpack.c.bf16 %v301_v36, %v300_v39 }
 0x17e   :  { %v291_v23 = vpop.f32.mrf.mxu1 }
 0x17f   :  { %v292_v26 = vadd.f32 %v291_v23, %v227_v22 }
 0x181   :  { %v302_v32 = vmax.f32 %v292_v26, 0.0 }
 0x186   :  { %v293_v28 = vpop.f32.mrf.mxu1 }
 0x187   :  { %v294_v30 = vadd.f32 %v293_v28, %v232_v21  ;;  %v705_v28 = vld [vmem:[%s981_s7 + $0x8] sm:$0xff] }
 0x189   :  { %v303_v33 = vmax.f32 %v294_v30, 0.0  ;;  %v707_v30 = vld [vmem:[%s981_s7 + $0x18] sm:$0xff] }
 0x18b   :  { %v307_v37 = vpack.c.bf16 %v303_v33, %v302_v32 }
 0x18d   :  { %400 = vmatpush.bf16.msra.mxu2 %v307_v37  ;;  %v491_v37 = vpop.permute.xlu1 %490 }
 0x191   :  { %401 = vmatpush.bf16.msra.mxu2 %v306_v43  ;;  %v481_v43 = vpop.permute.xlu0 %480 }
 0x195   :  { %402 = vmatpush.bf16.msra.mxu2 %v305_v48  ;;  %v466_v41 = vpop.permute.xlu1 %465 }
 0x199   :  { %403 = vmatpush.bf16.msra.mxu2 %v304_v50  ;;  %v471_v50 = vpop.permute.xlu2 %470 }
 0x19c   :  { %666 = vmatmul.msk.bf16.vlgmr.msra.gmra.mxu2 %vm254_vm1, %v700_v51 }
 0x1ac   :  { %667 = vmatmul.msk.bf16.gmra.mxu2 %vm254_vm1, %v701_v52 }
 0x1bc   :  { %668 = vmatmul.msk.bf16.gmra.mxu2 %vm254_vm1, %v702_v53 }
 0x1cc   :  { %669 = vmatmul.msk.bf16.gmra.mxu2 %vm254_vm1, %v703_v54 }
 0x21f   :  { %v405_v55 = vpop.f32.mrf.mxu2 }
 0x220   :  { %v406_v21 = vadd.f32 %v405_v55, %v327_v20 }
 0x222   :  { %v425_v25 = vmax.f32 %v406_v21, 0.0 }
 0x227   :  { %v407_v56 = vpop.f32.mrf.mxu2 }
 0x228   :  { %v408_v17 = vadd.f32 %v407_v56, %v332_v16  ;;  %v461_v56 = vpop.permute.xlu1 %460 }
 0x22a   :  { %v426_v23 = vmax.f32 %v408_v17, 0.0 }
 0x22c   :  { %v433_v26 = vpack.c.bf16 %v426_v23, %v425_v25 }
 0x22f   :  { %v410_v57 = vpop.f32.mrf.mxu2 }
 0x230   :  { %v411_v14 = vadd.f32 %v410_v57, %v337_v1 }
 0x232   :  { %v427_v22 = vmax.f32 %v411_v14, 0.0 }
 0x237   :  { %v412_v58 = vpop.f32.mrf.mxu2 }
 0x238   :  { %v413_v11 = vadd.f32 %v412_v58, %v342_v10 }
 0x23a   :  { %v428_v18 = vmax.f32 %v413_v11, 0.0 }
 0x23c   :  { %v434_v24 = vpack.c.bf16 %v428_v18, %v427_v22 }
 0x23f   :  { %v415_v59 = vpop.f32.mrf.mxu2 }
 0x240   :  { %v416_v7 = vadd.f32 %v415_v59, %v347_v0 }
 0x242   :  { %v429_v15 = vmax.f32 %v416_v7, 0.0 }
 0x247   :  { %v417_v60 = vpop.f32.mrf.mxu2 }
 0x248   :  { %v418_v5 = vadd.f32 %v417_v60, %v352_v3  ;;  %v456_v60 = vpop.permute.xlu0 %455  ;;  %v566_v3 = vld [vmem:[%s983_s9] sm:$0x7] }
 0x24a   :  { %v430_v12 = vmax.f32 %v418_v5, 0.0 }
 0x24c   :  { %v435_v19 = vpack.c.bf16 %v430_v12, %v429_v15 }
 0x24f   :  { %v420_v63 = vpop.f32.mrf.mxu2 }
 0x250   :  { %v421_v2 = vadd.f32 %v420_v63, %v357_v62 }
 0x252   :  { %v431_v8 = vmax.f32 %v421_v2, 0.0 }
 0x257   :  { %v422_v4 = vpop.f32.mrf.mxu2 }
 0x258   :  { %v423_v6 = vadd.f32 %v422_v4, %v362_v61  ;;  %v571_v4 = vpop.permute.xlu2 %570 }
 0x25a   :  { %v432_v9 = vmax.f32 %v423_v6, 0.0 }
 0x25c   :  { %v436_v13 = vpack.c.bf16 %v432_v9, %v431_v8 }
 0x25e   :  { %529 = vmatpush.bf16.msra.mxu3 %v436_v13 }
 0x262   :  { %530 = vmatpush.bf16.msra.mxu3 %v435_v19 }
 0x266   :  { %531 = vmatpush.bf16.msra.mxu3 %v434_v24 }
 0x26a   :  { %532 = vmatpush.bf16.msra.mxu3 %v433_v26 }
 0x26d   :  { %686 = vmatmul.msk.bf16.vlgmr.msra.gmra.mxu3 %vm254_vm1, %v704_v27 }
 0x27d   :  { %687 = vmatmul.msk.bf16.gmra.mxu3 %vm254_vm1, %v705_v28 }
 0x28d   :  { %688 = vmatmul.msk.bf16.gmra.mxu3 %vm254_vm1, %v706_v29 }
 0x29d   :  { %689 = vmatmul.msk.bf16.gmra.mxu3 %vm254_vm1, %v707_v30 }
 0x2f0   :  { %v534_v31 = vpop.f32.mrf.mxu3 }
 0x2f1   :  { %v535_v61 = vadd.f32 %v534_v31, %v456_v60 }
 0x2f3   :  { %v554_v1 = vmax.f32 %v535_v61, 0.0 }
 0x2f8   :  { %v536_v32 = vpop.f32.mrf.mxu3 }
 0x2f9   :  { %v537_v57 = vadd.f32 %v536_v32, %v461_v56 }
 0x2fb   :  { %v555_v63 = vmax.f32 %v537_v57, 0.0 }
 0x2fd   :  { %v562_v2 = vpack.c.bf16 %v555_v63, %v554_v1 }
 0x300   :  { %v539_v33 = vpop.f32.mrf.mxu3 }
 0x301   :  { %v540_v54 = vadd.f32 %v539_v33, %v466_v41 }
 0x303   :  { %v556_v62 = vmax.f32 %v540_v54, 0.0 }
 0x308   :  { %v541_v34 = vpop.f32.mrf.mxu3 }
 0x309   :  { %v542_v51 = vadd.f32 %v541_v34, %v471_v50 }
 0x30b   :  { %v557_v58 = vmax.f32 %v542_v51, 0.0 }
 0x30d   :  { %v563_v0 = vpack.c.bf16 %v557_v58, %v556_v62 }
 0x310   :  { %v544_v35 = vpop.f32.mrf.mxu3 }
 0x311   :  { %v545_v47 = vadd.f32 %v544_v35, %v476_v40 }
 0x313   :  { %v558_v55 = vmax.f32 %v545_v47, 0.0 }
 0x318   :  { %v546_v36 = vpop.f32.mrf.mxu3 }
 0x319   :  { %v547_v45 = vadd.f32 %v546_v36, %v481_v43 }
 0x31b   :  { %v559_v52 = vmax.f32 %v547_v45, 0.0 }
 0x31d   :  { %v564_v59 = vpack.c.bf16 %v559_v52, %v558_v55 }
 0x320   :  { %v549_v39 = vpop.f32.mrf.mxu3 }
 0x321   :  { %v550_v42 = vadd.f32 %v549_v39, %v486_v38 }
 0x323   :  { %v560_v48 = vmax.f32 %v550_v42, 0.0 }
 0x328   :  { %v551_v44 = vpop.f32.mrf.mxu3 }
 0x329   :  { %v552_v46 = vadd.f32 %v551_v44, %v491_v37 }
 0x32b   :  { %v561_v49 = vmax.f32 %v552_v46, 0.0 }
 0x32d   :  { %v565_v53 = vpack.c.bf16 %v561_v49, %v560_v48 }
 0x32f   :  { %580 = vmatpush.bf16.msrb.mxu0 %v565_v53 }
 0x333   :  { %581 = vmatpush.bf16.msrb.mxu0 %v564_v59 }
 0x337   :  { %582 = vmatpush.bf16.msrb.mxu0 %v563_v0 }
 0x33b   :  { %583 = vmatpush.bf16.msrb.mxu0 %v562_v2 }
 0x33e   :  { %690 = vmatmul.msk.bf16.vlgmr.msrb.gmra.mxu0 %vm254_vm1, %v566_v3 }
 0x3bb   :  { %v585_v5 = vpop.f32.mrf.mxu0 }
 0x3bc   :  { %v586_v6 = vadd.f32 %v585_v5, %v571_v4 }
 0x3be   :  { %589 = vst [vmem:[#allocation2] sm:$0x3f] %v586_v6 }
 0x3bf   :  { %600 = dma.vmem_to_hbm [thread:$0]  %s596_s4, 128, %s598_s10, [#allocation3]  }
 0x3c3   :  { %v587_v7 = vpop.f32.mrf.mxu0 }
 0x3c4   :  { %737 = dma.done.wait [#allocation3], 128  }
 0x3c5   :  { %738 = vsyncadd [#allocation3], 4294967168 }
 0x3c6   :  { %605 = vsyncpa [#allocation3], 1 }

</bundles_post_ra>
